<compile_context>
chip_gen: v6e
topology: v6e:2x2x1
jax: 0.10.0
libtpu: 0.0.40
codegen_flags: <defaults>
</compile_context>

<pallas_src>
import functools

import jax
import jax.numpy as jnp
from jax.experimental import pallas as pl
from jax.experimental.pallas import tpu as pltpu


def _round_up(x: int, m: int) -> int:
    return (x + m - 1) // m * m


def _qnet_kernel(x_ref, w1_ref, b1_ref, w2_ref, b2_ref, o_ref):
    # h = relu(x @ W1 + b1)  -- accumulate and activate in f32 (v5e-safe VPU path)
    h = jnp.dot(x_ref[...], w1_ref[...], preferred_element_type=jnp.float32)
    h = jnp.maximum(h + b1_ref[...], 0.0)            # (TB, H) + (1, H) broadcast
    # out = h @ W2 + b2
    out = jnp.dot(h.astype(w2_ref.dtype), w2_ref[...],
                  preferred_element_type=jnp.float32)
    o_ref[...] = (out + b2_ref[...]).astype(o_ref.dtype)


@functools.partial(jax.jit, static_argnames=("tb_max",))
def linear_qnet_forward(x, w1, b1, w2, b2, *, tb_max=2048):
    """x: (B, I); w1: (I, H); b1: (1, H); w2: (H, O); b2: (1, O). Returns (B, O)."""
    B, I = x.shape
    H = w1.shape[1]
    O = w2.shape[1]

    # Batch tile: multiple of 8 sublanes (f32).  Cap at ceil(B/2) so the grid
    # has >= 2 steps whenever B > 8 (lets v7x megacore shard the batch axis),
    # and at tb_max so huge batches still amortize per-step overhead well.
    half = -(-B // 2)                              # ceil(B / 2)
    TB = min(int(tb_max), max(8, _round_up(half, 8)))
    grid = pl.cdiv(B, TB)

    out = pl.pallas_call(
        _qnet_kernel,
        out_shape=jax.ShapeDtypeStruct((B, O), x.dtype),
        grid_spec=pl.GridSpec(
            grid=(grid,),
            in_specs=[
                pl.BlockSpec((TB, I), lambda i: (i, 0)),   # x tile, pipelined
                pl.BlockSpec((I, H), lambda i: (0, 0)),    # W1, VMEM-resident
                pl.BlockSpec((1, H), lambda i: (0, 0)),    # b1
                pl.BlockSpec((H, O), lambda i: (0, 0)),    # W2, VMEM-resident
                pl.BlockSpec((1, O), lambda i: (0, 0)),    # b2
            ],
            out_specs=pl.BlockSpec((TB, O), lambda i: (i, 0)),
        ),
        compiler_params=pltpu.CompilerParams(
            # Batch tiles are independent -> shard across v7x's 2 TensorCores.
            dimension_semantics=("parallel",),
        ),
    )(x, w1, b1, w2, b2)

    return out


def init_linear_qnet_params(key, input_size, hidden_size, output_size,
                            dtype=jnp.float32):
    """Matches PyTorch nn.Linear default init: U(-1/sqrt(fan_in), 1/sqrt(fan_in)).
    Weights are stored pre-transposed as (in_features, out_features)."""
    k1, k2, k3, k4 = jax.random.split(key, 4)
    bound1 = 1.0 / jnp.sqrt(float(input_size))
    bound2 = 1.0 / jnp.sqrt(float(hidden_size))
    w1 = jax.random.uniform(k1, (input_size, hidden_size), dtype,
                            minval=-bound1, maxval=bound1)
    b1 = jax.random.uniform(k2, (1, hidden_size), dtype,
                            minval=-bound1, maxval=bound1)
    w2 = jax.random.uniform(k3, (hidden_size, output_size), dtype,
                            minval=-bound2, maxval=bound2)
    b2 = jax.random.uniform(k4, (1, output_size), dtype,
                            minval=-bound2, maxval=bound2)
    return w1, b1, w2, b2


if __name__ == "__main__":
    # Small shapes consistent with Linear_QNet(input_size, hidden_size, output_size)
    batch, input_size, hidden_size, output_size = 2, 16, 32, 4

    key = jax.random.PRNGKey(0)
    kx, kp = jax.random.split(key)
    x = jax.random.normal(kx, (batch, input_size), dtype=jnp.float32)
    w1, b1, w2, b2 = init_linear_qnet_params(kp, input_size, hidden_size,
                                             output_size)

    def ref_fwd(xx):
        return jnp.maximum(xx @ w1 + b1, 0.0) @ w2 + b2

    # Tiny batch (single partial tile).
    out = jax.block_until_ready(linear_qnet_forward(x, w1, b1, w2, b2))
    assert out.shape == (batch, output_size)
    assert jnp.allclose(out, ref_fwd(x), atol=1e-5, rtol=1e-5)

    # Batch that is not a multiple of the tile (masked edge-tile path, grid=2).
    xb = jax.random.normal(kx, (37, input_size), dtype=jnp.float32)
    outb = jax.block_until_ready(linear_qnet_forward(xb, w1, b1, w2, b2))
    assert outb.shape == (37, output_size)
    assert jnp.allclose(outb, ref_fwd(xb), atol=1e-5, rtol=1e-5)

    # Larger batch: exercises the multi-tile / megacore-split path (grid=2).
    xc = jax.random.normal(kx, (256, input_size), dtype=jnp.float32)
    outc = jax.block_until_ready(linear_qnet_forward(xc, w1, b1, w2, b2))
    assert outc.shape == (256, output_size)
    assert jnp.allclose(outc, ref_fwd(xc), atol=1e-5, rtol=1e-5)

    print("KERNEL_OK")
</pallas_src>

<mosaic_0001>
module attributes {stable_mosaic.version = 11 : i64} {
  func.func @_qnet_kernel(%arg0: i32, %arg1: memref<8x16xf32, #tpu.memory_space<vmem>>, %arg2: memref<16x32xf32, #tpu.memory_space<vmem>>, %arg3: memref<1x32xf32, #tpu.memory_space<vmem>>, %arg4: memref<32x4xf32, #tpu.memory_space<vmem>>, %arg5: memref<1x4xf32, #tpu.memory_space<vmem>>, %arg6: memref<8x4xf32, #tpu.memory_space<vmem>>) attributes {dimension_semantics = [#tpu.dimension_semantics<parallel>], iteration_bounds = array<i64: 1>, scalar_prefetch = 0 : i64, scratch_operands = 0 : i64, tpu.core_type = #tpu.core_type<tc>, window_params = [{transform_indices = @transform_0, window_bounds = array<i64: 8, 16>}, {pipeline_mode = #tpu.pipeline_mode<synchronous>, transform_indices = @transform_1, window_bounds = array<i64: 16, 32>}, {pipeline_mode = #tpu.pipeline_mode<synchronous>, transform_indices = @transform_2, window_bounds = array<i64: 1, 32>}, {pipeline_mode = #tpu.pipeline_mode<synchronous>, transform_indices = @transform_3, window_bounds = array<i64: 32, 4>}, {pipeline_mode = #tpu.pipeline_mode<synchronous>, transform_indices = @transform_4, window_bounds = array<i64: 1, 4>}, {transform_indices = @transform_5, window_bounds = array<i64: 8, 4>}]} {
    %c0 = arith.constant 0 : index
    %c0_0 = arith.constant 0 : index
    %0 = vector.load %arg1[%c0, %c0_0] : memref<8x16xf32, #tpu.memory_space<vmem>>, vector<8x16xf32>
    %c0_1 = arith.constant 0 : index
    %c0_2 = arith.constant 0 : index
    %1 = vector.load %arg2[%c0_1, %c0_2] : memref<16x32xf32, #tpu.memory_space<vmem>>, vector<16x32xf32>
    %cst = arith.constant dense<0.000000e+00> : vector<8x32xf32>
    %2 = tpu.matmul %0, %1, %cst {dimension_numbers = #tpu.dot_dimension_numbers<[1], [0], [0], [1], [0, 0, 1, 1], [], []>} : vector<8x16xf32>, vector<16x32xf32>, vector<8x32xf32> -> vector<8x32xf32>
    %c0_3 = arith.constant 0 : index
    %c0_4 = arith.constant 0 : index
    %3 = vector.load %arg3[%c0_3, %c0_4] : memref<1x32xf32, #tpu.memory_space<vmem>>, vector<1x32xf32>
    %4 = vector.broadcast %3 : vector<1x32xf32> to vector<8x32xf32>
    %5 = arith.addf %2, %4 : vector<8x32xf32>
    %cst_5 = arith.constant 0.000000e+00 : f32
    %6 = vector.broadcast %cst_5 : f32 to vector<8x32xf32>
    %7 = arith.maximumf %5, %6 : vector<8x32xf32>
    %c0_6 = arith.constant 0 : index
    %c0_7 = arith.constant 0 : index
    %8 = vector.load %arg4[%c0_6, %c0_7] : memref<32x4xf32, #tpu.memory_space<vmem>>, vector<32x4xf32>
    %cst_8 = arith.constant dense<0.000000e+00> : vector<8x4xf32>
    %9 = tpu.matmul %7, %8, %cst_8 {dimension_numbers = #tpu.dot_dimension_numbers<[1], [0], [0], [1], [0, 0, 1, 1], [], []>} : vector<8x32xf32>, vector<32x4xf32>, vector<8x4xf32> -> vector<8x4xf32>
    %c0_9 = arith.constant 0 : index
    %c0_10 = arith.constant 0 : index
    %10 = vector.load %arg5[%c0_9, %c0_10] : memref<1x4xf32, #tpu.memory_space<vmem>>, vector<1x4xf32>
    %11 = vector.broadcast %10 : vector<1x4xf32> to vector<8x4xf32>
    %12 = arith.addf %9, %11 : vector<8x4xf32>
    %c0_11 = arith.constant 0 : index
    %c0_12 = arith.constant 0 : index
    %13 = vector.load %arg6[%c0_11, %c0_12] : memref<8x4xf32, #tpu.memory_space<vmem>>, vector<8x4xf32>
    tpu.vector_store %arg6[%c0_11, %c0_12], %12 {strides = array<i32>} : memref<8x4xf32, #tpu.memory_space<vmem>>, vector<8x4xf32>,
    return
  }
  func.func @transform_0(%arg0: i32) -> (i32, i32) {
    %c0_i32 = arith.constant 0 : i32
    %c0_i32_0 = arith.constant 0 : i32
    return %arg0, %c0_i32 : i32, i32
  }
  func.func @transform_1(%arg0: i32) -> (i32, i32) {
    %c0_i32 = arith.constant 0 : i32
    %c0_i32_0 = arith.constant 0 : i32
    %c0_i32_1 = arith.constant 0 : i32
    return %c0_i32, %c0_i32_0 : i32, i32
  }
  func.func @transform_2(%arg0: i32) -> (i32, i32) {
    %c0_i32 = arith.constant 0 : i32
    %c0_i32_0 = arith.constant 0 : i32
    %c0_i32_1 = arith.constant 0 : i32
    return %c0_i32, %c0_i32_0 : i32, i32
  }
  func.func @transform_3(%arg0: i32) -> (i32, i32) {
    %c0_i32 = arith.constant 0 : i32
    %c0_i32_0 = arith.constant 0 : i32
    %c0_i32_1 = arith.constant 0 : i32
    return %c0_i32, %c0_i32_0 : i32, i32
  }
  func.func @transform_4(%arg0: i32) -> (i32, i32) {
    %c0_i32 = arith.constant 0 : i32
    %c0_i32_0 = arith.constant 0 : i32
    %c0_i32_1 = arith.constant 0 : i32
    return %c0_i32, %c0_i32_0 : i32, i32
  }
  func.func @transform_5(%arg0: i32) -> (i32, i32) {
    %c0_i32 = arith.constant 0 : i32
    %c0_i32_0 = arith.constant 0 : i32
    return %arg0, %c0_i32 : i32, i32
  }
}

</mosaic_0001>

<bundles_post_ra>
// kernel: linear_qnet_forward.1
= control target key start
LH: loop header
LB: loop body
LE: loop exit
PB: predicated region body
PF: predicated region fallthrough
CT: control target
= control target key end

     0   :  { %10 = vsyncpa [#allocation3], 0  ;;  %v266_v1 = vmov 0.0   ;;  %vm267_vm0 = vmmov 0   ;;  %vm31_vm1 = vcmask 130048   ;;  %vm117_vm2 = vcmask 261120   ;;  %s331_s0 = inlined_call_operand.vmem [shape: f32[2,16], index: 0, kind: input, shape index: {}]   ;;  %s332_s1 = inlined_call_operand.vmem [shape: f32[16,32], index: 1, kind: input, shape index: {}]   ;;  %s333_s2 = inlined_call_operand.vmem [shape: f32[1,32], index: 2, kind: input, shape index: {}]   ;;  %s334_s3 = inlined_call_operand.vmem [shape: f32[32,4], index: 3, kind: input, shape index: {}]   ;;  %s335_s4 = inlined_call_operand.vmem [shape: f32[1,4], index: 4, kind: input, shape index: {}]   ;;  %s336_s5 = inlined_call_operand.hbm [shape: f32[2,4], index: 5, kind: output, shape index: {}]  }
   0x1   :  { %v23_v0 = vld [vmem:[%s332_s1 + $0x8] sm:$0xff]  ;;  %221 = vmatprep.subr.mxu0 %v266_v1  ;;  %v22_v2 = vld [vmem:[%s332_s1] sm:$0xff]  ;;  %225 = vmatprep.mubr.msk.f32.mxu0 %vm267_vm0, %v266_v1  ;;  %v109_v3 = vld [vmem:[%s334_s3 + $0x18] sm:$0xff]  ;;  %vm191_vm3 = vcmask 31744  }
   0x2   :  { %222 = vmatpush3.msra.mxu0 %v23_v0  ;;  %v21_v4 = vld [vmem:[%s331_s0] sm:$0xff]  ;;  %228 = vmatprep.subr.mxu1 %v266_v1  ;;  %v108_v5 = vld [vmem:[%s334_s3 + $0x10] sm:$0xff]  ;;  %v107_v6 = vld [vmem:[%s334_s3 + $0x8] sm:$0xff] }
   0x3   :  { %223 = vmatprep.subr.mxu0 %v266_v1  ;;  %229 = vmatpush3.msra.mxu1 %v109_v3  ;;  %v106_v7 = vld [vmem:[%s334_s3] sm:$0xff] }
   0x4   :  { %224 = vmatpush3.msra.mxu0 %v22_v2  ;;  %230 = vmatprep.subr.mxu1 %v266_v1  ;;  %v209_v8 = vld [vmem:[%s333_s2] ss:$0 sm:$0xff] }
   0x5   :  { %226 = vmatmul.mubr.msk.f32.vlgmr.msra.gmra.mxu0 %vm31_vm1, %v21_v4  ;;  %236 = vmatprep.mubr.msk.f32.mxu1 %vm267_vm0, %v266_v1  ;;  %v211_v13 = vld [vmem:[%s335_s4] ss:$0 sm:$0xff] }
   0x6   :  { %231 = vmatpush3.msra.mxu1 %v108_v5 }
   0x7   :  { %232 = vmatprep.subr.mxu1 %v266_v1 }
   0x8   :  { %233 = vmatpush3.msra.mxu1 %v107_v6 }
   0x9   :  { %234 = vmatprep.subr.mxu1 %v266_v1 }
   0xa   :  { %235 = vmatpush3.msra.mxu1 %v106_v7 }
  0xc5   :  { %v101_v9 = vpop.f32.mrf.mxu0 }
  0xc6   :  { %v102_v10 = vadd.f32 %v209_v8, %v101_v9 }
  0xc7   :  { %v227_v11 = vpop.f32.mrf.mxu0 }
  0xc8   :  { %v105_v12 = vmax.f32 %v102_v10, 0.0 }
  0xca   :  { %237 = vmatmul.mubr.msk.f32.vlgmr.msra.gmra.mxu1 %vm117_vm2, %v105_v12 }
 0x18a   :  { %v187_v14 = vpop.f32.mrf.mxu1 }
 0x18b   :  { %v188_v15 = vadd.f32 %v211_v13, %v187_v14 }
 0x18c   :  { %v238_v16 = vpop.f32.mrf.mxu1 }
 0x18d   :  { %192 = vst.msk [vmem:[#allocation2] sm:$0xff] %vm191_vm3, %v188_v15 }
 0x18e   :  { %197 = vsyncadd [#allocation3], 96  ;;  %s268_s3 = smov [#allocation2]  }
 0x18f   :  { %s198_s9 = sshll.u32 %s268_s3, 4  ;;  %s199_s9 = int_to_ptr.vmem [resolvable:$true] %s198_s9 }
 0x190   :  { %s244_s2 = scalar_lea.vmem %s199_s9, 32  ;;  %s248_s10 = scalar_lea.vmem %s199_s9, 128 }
 0x191   :  { %p245_p0 = scmp.ne.s32.totalorder %s199_s9, %s244_s2  ;;  %p249_p1 = scmp.lt.s32.totalorder %s199_s9, %s199_s9 }
 0x192   :  { %p250_p2 = scmp.lt.s32.totalorder %s248_s10, %s244_s2 }
 0x194   :  { %p251_p3 = por %p250_p2, %p249_p1 }
 0x196   :  { %p252_p4 = pnand %p251_p3, %p245_p0 }
 0x198   :  { %255 = shalt.err (!%p252_p4)
}
 0x199   :  { %s269_s11 = smov 32   ;;  %s270_s12 = smov 2  }
 0x19a   :  { %204 = dma.vmem_to_hbm [thread:$0]  %s199_s9, 32, %s336_s5, [#allocation3], %s269_s11, %s269_s11, %s270_s12  }
 0x19b   :  { %264 = dma.done.wait [#allocation3], 128  }
 0x19c   :  { %265 = vsyncadd [#allocation3], 4294967168 }
 0x19d   :  { %208 = vsyncpa [#allocation3], 1 }

</bundles_post_ra>
